<compile_context>
chip_gen: v6e
topology: v6e:2x2x1
jax: 0.10.0
libtpu: 0.0.40
codegen_flags: <defaults>
</compile_context>

<pallas_src>
import functools
import math

import jax
import jax.numpy as jnp
from jax.experimental import pallas as pl
from jax.experimental.pallas import tpu as pltpu


def _round_up(x, m):
    return ((x + m - 1) // m) * m


# -----------------------------------------------------------------------------
# Pallas kernel 1: all-pairs correlation volume (the matmul inside CorrBlock.__init__)
#   corr[n, i, j] = <fmap1[n, :, i], fmap2[n, :, j]> / sqrt(C)
# a is pre-relaid to (HW, C) so the MXU gets a natural (M,K)x(K,N) feed; b (the fmap2
# panel) is kept VMEM-resident across the whole i sweep whenever it fits the budget.
# -----------------------------------------------------------------------------
def _corr_kernel(a_ref, b_ref, o_ref, *, inv_sqrt_c):
    # a_ref: (TM, C) bf16, b_ref: (C, TN) bf16, o_ref: (TM, TN) out_dtype
    acc = jnp.dot(a_ref[...], b_ref[...], preferred_element_type=jnp.float32)
    o_ref[...] = (acc * inv_sqrt_c).astype(o_ref.dtype)


def _pick_corr_tiles(hw_pad, c, out_bytes, budget_bytes):
    """Largest MXU-aligned tiles whose double-buffered VMEM footprint fits the budget."""
    # Preferred: fmap2 panel fully resident (TN = hw_pad) -> b DMA'd once per batch item.
    for tm in (512, 256, 128):
        if hw_pad % tm:
            continue
        need = 2 * (tm * c * 2 + c * hw_pad * 2 + tm * hw_pad * out_bytes)
        if need <= budget_bytes:
            return tm, hw_pad, need
    # Fallback for very large HW: tile the j axis too.
    for tn in (2048, 1024, 512, 256, 128):
        if hw_pad % tn:
            continue
        for tm in (512, 256, 128):
            if hw_pad % tm:
                continue
            need = 2 * (tm * c * 2 + c * tn * 2 + tm * tn * out_bytes)
            if need <= budget_bytes:
                return tm, tn, need
    return 128, 128, 2 * (128 * c * 2 + c * 128 * 2 + 128 * 128 * out_bytes)


def corr_volume_pallas(fmap1, fmap2, *, out_dtype=jnp.bfloat16, crop=False,
                       vmem_budget_bytes=48 * 1024 * 1024):
    """All-pairs correlation volume.

    Returns the lane-padded (N, HW_pad, HW_pad) volume; the valid region is
    [:, :HW, :HW].  By default no crop is materialized (saves a full HBM pass over the
    largest tensor) — downstream CorrBlock lookup should fold the crop.  Set crop=True
    to get the exact (N, HW, HW) tensor.
    """
    N, C, H, W = fmap1.shape
    HW = H * W
    HW_pad = _round_up(HW, 128)
    out_bytes = jnp.dtype(out_dtype).itemsize
    TM, TN, need = _pick_corr_tiles(HW_pad, C, out_bytes, vmem_budget_bytes)

    # One-time HBM relayout of fmap1 to (N, HW, C): negligible next to the HW^2 output
    # and avoids any per-step in-kernel transpose of the LHS tile.
    a = jnp.transpose(fmap1.reshape(N, C, HW), (0, 2, 1)).astype(jnp.bfloat16)
    b = fmap2.reshape(N, C, HW).astype(jnp.bfloat16)
    if HW_pad != HW:
        pad = HW_pad - HW
        a = jnp.pad(a, ((0, 0), (0, pad), (0, 0)))
        b = jnp.pad(b, ((0, 0), (0, 0), (0, pad)))

    kernel = functools.partial(_corr_kernel, inv_sqrt_c=1.0 / math.sqrt(float(C)))
    vmem_limit = int(min(64 * 1024 * 1024,
                         max(32 * 1024 * 1024, need + 4 * 1024 * 1024)))
    out = pl.pallas_call(
        kernel,
        out_shape=jax.ShapeDtypeStruct((N, HW_pad, HW_pad), out_dtype),
        grid=(N, HW_pad // TM, HW_pad // TN),
        in_specs=[
            pl.BlockSpec((None, TM, C), lambda n, i, j: (n, i, 0)),
            # block index constant over i -> panel stays resident across the i sweep
            pl.BlockSpec((None, C, TN), lambda n, i, j: (n, 0, j)),
        ],
        out_specs=pl.BlockSpec((None, TM, TN), lambda n, i, j: (n, i, j)),
        compiler_params=pltpu.CompilerParams(
            dimension_semantics=("parallel", "parallel", "parallel"),
            vmem_limit_bytes=vmem_limit),
    )(a, b)
    if crop and HW_pad != HW:
        out = out[:, :HW, :HW]
    return out


# -----------------------------------------------------------------------------
# Pallas kernel 2: convex flow upsampling — exact port of SKNetRES_IN.upsample_flow
#   mask -> softmax over 9 taps; up_flow = sum_k softmax(mask)_k * unfold(8*flow)_k
# Lane-dense: (H, W) flattened onto the lane axis, tiled in 128-multiples.
# Softmax-denominator and both channel accumulations fused into one k-loop so only a
# single exp intermediate is live at a time (no VMEM spill passes over es[k]).
# -----------------------------------------------------------------------------
def _upsample_flow_kernel(mask_ref, taps_ref, out_ref):
    # mask_ref: (9*64, T) bf16 logits, row = k*64 + s   (k: 3x3 tap, s = di*8 + dj)
    # taps_ref: (18, T)   f32, row = k*2 + c (c: flow channel), values = unfold(8*flow)
    # out_ref : (2, 64, T) f32
    def row_block(k):  # aligned 64-row view of the mask tile, upcast to f32 (v5e: no bf16 VPU)
        return mask_ref[k * 64:(k + 1) * 64, :].astype(jnp.float32)

    mmax = row_block(0)
    for k in range(1, 9):
        mmax = jnp.maximum(mmax, row_block(k))

    taps = taps_ref[...]                                      # (18, T) f32

    e = jnp.exp(row_block(0) - mmax)                          # single live exp intermediate
    denom = e
    acc0 = e * taps[0, :][None, :]                            # (T,) -> (64,T) sublane bcast
    acc1 = e * taps[1, :][None, :]
    for k in range(1, 9):
        e = jnp.exp(row_block(k) - mmax)
        denom = denom + e
        acc0 = acc0 + e * taps[2 * k + 0, :][None, :]
        acc1 = acc1 + e * taps[2 * k + 1, :][None, :]

    inv = pl.reciprocal(denom, approx=True)                   # one EUP pass, deferred norm
    out_ref[0, :, :] = (acc0 * inv).astype(out_ref.dtype)
    out_ref[1, :, :] = (acc1 * inv).astype(out_ref.dtype)


def upsample_flow_pallas(flow, mask, *, lane_tile=1024):
    """Upsample flow [N,2,H/8,W/8] -> [N,2,H,W] by convex combination (as in the module)."""
    N, _, H, W = flow.shape
    HW = H * W
    T = lane_tile if HW >= lane_tile else _round_up(HW, 128)
    HW_pad = _round_up(HW, T)

    # glue: the 9 zero-padded 3x3 unfold taps of 8*flow, flattened lane-dense -> (N, 18, HW).
    # Taps stay f32 (18 rows ~ 3% of the traffic; bf16 there would cost flow precision).
    fp = jnp.pad(8.0 * flow, ((0, 0), (0, 0), (1, 1), (1, 1)))
    taps = jnp.stack([fp[:, :, dh:dh + H, dw:dw + W]
                      for dh in range(3) for dw in range(3)], axis=1)   # (N, 9, 2, H, W)
    taps = taps.reshape(N, 18, HW)
    # Mask logits in bf16: the 9*64-row mask dominates HBM traffic; softmax math is f32 in-kernel.
    mask_flat = mask.reshape(N, 9 * 64, HW).astype(jnp.bfloat16)
    if HW_pad != HW:
        pad = HW_pad - HW
        taps = jnp.pad(taps, ((0, 0), (0, 0), (0, pad)))
        mask_flat = jnp.pad(mask_flat, ((0, 0), (0, 0), (0, pad)))

    up = pl.pallas_call(
        _upsample_flow_kernel,
        out_shape=jax.ShapeDtypeStruct((N, 2, 64, HW_pad), jnp.float32),
        grid=(N, HW_pad // T),
        in_specs=[
            pl.BlockSpec((None, 9 * 64, T), lambda n, t: (n, 0, t)),
            pl.BlockSpec((None, 18, T), lambda n, t: (n, 0, t)),
        ],
        out_specs=pl.BlockSpec((None, 2, 64, T), lambda n, t: (n, 0, 0, t)),
        compiler_params=pltpu.CompilerParams(
            dimension_semantics=("parallel", "parallel"),
            vmem_limit_bytes=32 * 1024 * 1024),
    )(mask_flat, taps)

    # glue: drop lane padding + pixel-shuffle (N,2,8,8,H,W) -> (N,2,H,8,W,8) -> (N,2,8H,8W)
    # TODO(synk): fold this unshuffle into the consumer (or emit a W-on-lanes layout) to save
    # one HBM pass over the 8Hx8W flow; kept as XLA glue here for exact module semantics.
    up = up[:, :, :, :HW].reshape(N, 2, 8, 8, H, W)
    up = jnp.transpose(up, (0, 1, 4, 2, 5, 3))
    return up.reshape(N, 2, 8 * H, 8 * W)


# -----------------------------------------------------------------------------
# Pure-JAX references (used only for the correctness checks in __main__)
# -----------------------------------------------------------------------------
def _corr_volume_ref(fmap1, fmap2):
    # Matches the kernel's input numerics: bf16 inputs, f32 accumulation (output kept f32;
    # the kernel's bf16 store is covered by the comparison tolerance).
    N, C, H, W = fmap1.shape
    a = fmap1.reshape(N, C, H * W).astype(jnp.bfloat16)
    b = fmap2.reshape(N, C, H * W).astype(jnp.bfloat16)
    out = jnp.einsum("nci,ncj->nij", a, b, preferred_element_type=jnp.float32)
    return out / math.sqrt(float(C))


def _upsample_flow_ref(flow, mask):
    # Matches the kernel's input numerics: mask logits quantized to bf16, f32 softmax/taps.
    N, _, H, W = flow.shape
    mq = mask.astype(jnp.bfloat16).astype(jnp.float32)
    m = jax.nn.softmax(mq.reshape(N, 1, 9, 8, 8, H, W), axis=2)
    fp = jnp.pad(8.0 * flow, ((0, 0), (0, 0), (1, 1), (1, 1)))
    patches = jnp.stack([fp[:, :, dh:dh + H, dw:dw + W]
                         for dh in range(3) for dw in range(3)], axis=2)  # (N,2,9,H,W)
    uf = patches.reshape(N, 2, 9, 1, 1, H, W)
    up = jnp.sum(m * uf, axis=2)
    up = jnp.transpose(up, (0, 1, 4, 2, 5, 3))
    return up.reshape(N, 2, 8 * H, 8 * W)


# -----------------------------------------------------------------------------
# SKNetRES_IN glue: initialize_flow + iterative refinement loop structure
# -----------------------------------------------------------------------------
def coords_grid(batch, ht, wd):
    ys, xs = jnp.meshgrid(jnp.arange(ht), jnp.arange(wd), indexing="ij")
    coords = jnp.stack([xs, ys], axis=0).astype(jnp.float32)  # channel 0 = x, 1 = y (RAFT)
    return jnp.broadcast_to(coords[None], (batch, 2, ht, wd))


def sknet_res_in_forward(events1, events2, iters=2, key=None):
    """Mirrors SKNetRES_IN.forward; Pallas kernels implement the correlation-volume
    matmul and the convex flow-upsampling hot paths."""
    N, _, H, W = events1.shape
    H8, W8 = H // 8, W // 8
    key = jax.random.PRNGKey(0) if key is None else key
    k_f1, k_f2, k_df, k_um = jax.random.split(key, 4)

    # TODO(synk): MIMOUNet / SK / BasicEncoder (fnet, cnet) / Attention are not defined in the
    # provided reference source; deterministic stand-in feature maps are used in their place.
    fmap1 = jax.random.normal(k_f1, (N, 256, H8, W8), jnp.float32)
    fmap2 = jax.random.normal(k_f2, (N, 256, H8, W8), jnp.float32)

    # CorrBlock construction (all-pairs volume) — tiled Pallas matmul kernel.
    # Returned lane-padded (valid region [:HW, :HW]); the crop is folded into the consumer.
    # TODO(synk): CorrBlock's correlation pyramid + radius-4 bilinear lookup is not ported.
    corr = corr_volume_pallas(fmap1, fmap2)  # (N, HW_pad, HW_pad) bf16

    coords0 = coords_grid(N, H8, W8)
    coords1 = coords_grid(N, H8, W8)

    flow_predictions = []
    for itr in range(iters):
        # TODO(synk): SKUpdateBlock6_Deep_nopoolres_AllDecoder is not defined in the reference
        # source; deterministic stand-in (delta_flow, up_mask) tensors are used instead.
        delta_flow = 0.25 * jax.random.normal(jax.random.fold_in(k_df, itr),
                                              (N, 2, H8, W8), jnp.float32)
        up_mask = jax.random.normal(jax.random.fold_in(k_um, itr),
                                    (N, 64 * 9, H8, W8), jnp.float32)
        coords1 = coords1 + delta_flow
        flow_up = upsample_flow_pallas(coords1 - coords0, up_mask)  # Pallas kernel
        flow_predictions.append(flow_up)
    return corr, flow_predictions


if __name__ == "__main__":
    key = jax.random.PRNGKey(0)
    N, C_EV, H, W = 2, 5, 32, 32  # n_first_channels = 5 in the module; H,W divisible by 8
    k_e1, k_e2, k_fwd, k_chk = jax.random.split(key, 4)
    events1 = jax.random.normal(k_e1, (N, C_EV, H, W), jnp.float32)
    events2 = jax.random.normal(k_e2, (N, C_EV, H, W), jnp.float32)

    corr, flow_predictions = sknet_res_in_forward(events1, events2, iters=2, key=k_fwd)
    jax.block_until_ready((corr, flow_predictions))

    # --- correctness checks of the Pallas kernels against pure-JAX references ---
    kk1, kk2, kk3, kk4 = jax.random.split(k_chk, 4)

    # corr volume: multi-tile padded path (HW = 576 -> HW_pad = 640, resident-b, TM = 128)
    f1 = jax.random.normal(kk1, (N, 256, 24, 24), jnp.float32)
    f2 = jax.random.normal(kk2, (N, 256, 24, 24), jnp.float32)
    c_pl = corr_volume_pallas(f1, f2)
    c_ref = _corr_volume_ref(f1, f2)
    assert c_pl.shape == (N, 640, 640)        # padded volume, valid region [:576, :576]
    # tolerance covers the bf16 output store on top of the bf16-input / f32-acc reference
    assert jnp.allclose(c_pl[:, :576, :576].astype(jnp.float32), c_ref,
                        atol=3e-2, rtol=2e-2), "corr volume mismatch"

    # upsample_flow: HW = 640 -> single 640-lane tile (no padding, no crop)
    flw = jax.random.normal(kk3, (N, 2, 16, 40), jnp.float32)
    msk = jax.random.normal(kk4, (N, 64 * 9, 16, 40), jnp.float32)
    u_pl = upsample_flow_pallas(flw, msk)
    u_ref = _upsample_flow_ref(flw, msk)
    assert u_pl.shape == (N, 2, 128, 320)
    # tolerance relaxed vs exact f32: approximate EUP reciprocal in the kernel
    assert jnp.allclose(u_pl, u_ref, atol=1e-2, rtol=1e-2), "upsample_flow mismatch"

    HW8 = (H // 8) * (W // 8)
    assert corr.shape == (N, _round_up(HW8, 128), _round_up(HW8, 128))
    assert flow_predictions[0].shape == (N, 2, H, W)
    print("KERNEL_OK")
</pallas_src>

<mosaic_0001>
module attributes {stable_mosaic.version = 11 : i64} {
  func.func @_corr_kernel(%arg0: i32, %arg1: i32, %arg2: i32, %arg3: memref<1x128x256xbf16, #tpu.memory_space<vmem>>, %arg4: memref<1x256x128xbf16, #tpu.memory_space<vmem>>, %arg5: memref<1x128x128xbf16, #tpu.memory_space<vmem>>) attributes {dimension_semantics = [#tpu.dimension_semantics<parallel>, #tpu.dimension_semantics<parallel>, #tpu.dimension_semantics<parallel>], iteration_bounds = array<i64: 2, 1, 1>, scalar_prefetch = 0 : i64, scratch_operands = 0 : i64, tpu.core_type = #tpu.core_type<tc>, window_params = [{transform_indices = @transform_0, window_bounds = array<i64: 1, 128, 256>}, {transform_indices = @transform_1, window_bounds = array<i64: 1, 256, 128>}, {transform_indices = @transform_2, window_bounds = array<i64: 1, 128, 128>}]} {
    %c0 = arith.constant 0 : index
    %c0_0 = arith.constant 0 : index
    %c0_1 = arith.constant 0 : index
    %0 = vector.load %arg3[%c0, %c0_0, %c0_1] : memref<1x128x256xbf16, #tpu.memory_space<vmem>>, vector<1x128x256xbf16>
    %1 = vector.shape_cast %0 : vector<1x128x256xbf16> to vector<128x256xbf16>
    %c0_2 = arith.constant 0 : index
    %c0_3 = arith.constant 0 : index
    %c0_4 = arith.constant 0 : index
    %2 = vector.load %arg4[%c0_2, %c0_3, %c0_4] : memref<1x256x128xbf16, #tpu.memory_space<vmem>>, vector<1x256x128xbf16>
    %3 = vector.shape_cast %2 : vector<1x256x128xbf16> to vector<256x128xbf16>
    %cst = arith.constant dense<0.000000e+00> : vector<128x128xf32>
    %4 = tpu.matmul %1, %3, %cst {dimension_numbers = #tpu.dot_dimension_numbers<[1], [0], [0], [1], [0, 0, 1, 1], [], []>} : vector<128x256xbf16>, vector<256x128xbf16>, vector<128x128xf32> -> vector<128x128xf32>
    %cst_5 = arith.constant 6.250000e-02 : f32
    %5 = vector.broadcast %cst_5 : f32 to vector<128x128xf32>
    %6 = arith.mulf %4, %5 : vector<128x128xf32>
    %7 = arith.truncf %6 : vector<128x128xf32> to vector<128x128xbf16>
    %c0_6 = arith.constant 0 : index
    %c0_7 = arith.constant 0 : index
    %c0_8 = arith.constant 0 : index
    %8 = vector.load %arg5[%c0_6, %c0_7, %c0_8] : memref<1x128x128xbf16, #tpu.memory_space<vmem>>, vector<1x128x128xbf16>
    %9 = vector.shape_cast %8 : vector<1x128x128xbf16> to vector<128x128xbf16>
    %10 = vector.shape_cast %7 : vector<128x128xbf16> to vector<1x128x128xbf16>
    tpu.vector_store %arg5[%c0_6, %c0_7, %c0_8], %10 {strides = array<i32>} : memref<1x128x128xbf16, #tpu.memory_space<vmem>>, vector<1x128x128xbf16>,
    return
  }
  func.func @transform_0(%arg0: i32, %arg1: i32, %arg2: i32) -> (i32, i32, i32) {
    %c0_i32 = arith.constant 0 : i32
    %c0_i32_0 = arith.constant 0 : i32
    return %arg0, %arg1, %c0_i32 : i32, i32, i32
  }
  func.func @transform_1(%arg0: i32, %arg1: i32, %arg2: i32) -> (i32, i32, i32) {
    %c0_i32 = arith.constant 0 : i32
    %c0_i32_0 = arith.constant 0 : i32
    return %arg0, %c0_i32, %arg2 : i32, i32, i32
  }
  func.func @transform_2(%arg0: i32, %arg1: i32, %arg2: i32) -> (i32, i32, i32) {
    %c0_i32 = arith.constant 0 : i32
    return %arg0, %arg1, %arg2 : i32, i32, i32
  }
}

</mosaic_0001>

<bundles_post_ra>
// kernel: tpu_custom_call.1
= control target key start
LH: loop header
LB: loop body
LE: loop exit
PB: predicated region body
PF: predicated region fallthrough
CT: control target
= control target key end

     0   :  { %7 = vsyncpa [#allocation3], 0  ;;  %s1507_s0 = inlined_call_operand.hbm [shape: bf16[2,128,256], index: 0, kind: input, shape index: {}]   ;;  %s1508_s1 = inlined_call_operand.hbm [shape: bf16[2,256,128], index: 1, kind: input, shape index: {}]   ;;  %s1509_s2 = inlined_call_operand.hbm [shape: bf16[2,128,128], index: 2, kind: output, shape index: {}]  }
   0x1   :  { %9 = vsyncpa [#allocation3 + $0x1], 0 }
   0x2   :  { %10 = vsyncpa [#allocation6], 0 }
   0x3   :  { %12 = vsyncpa [#allocation6 + $0x1], 0 }
   0x4   :  { %13 = vsyncpa [#allocation4], 0 }
   0x5   :  { %15 = vsyncpa [#allocation4 + $0x1], 0  ;;  %s1278_s9 = smov 0   ;;  %s1280_s10 = smov 0  }
   0x6   :  { %s1282_s11 = smov 0   ;;  %s1284_s12 = smov 0  }
   0x7   :  { %s1286_s13 = smov 0   ;;  %s1288_s14 = smov 0  }
   0x8 LB: > { %s786_s15 = sadd.s32 4294967295, %s1252_s14   ;;  %s787_s16 = sadd.s32 4294967294, %s1252_s14   ;;  %s1252_s14 = sphi %s1288_s14, %s21_s14   ;;  %s1248_s13 = sphi %s1286_s13, %s1520_s13   ;;  %s1244_s12 = sphi %s1284_s12, %s1519_s12   ;;  %s1240_s11 = sphi %s1282_s11, %s1518_s11   ;;  %s1236_s10 = sphi %s1280_s10, %s1517_s10   ;;  %s1232_s9 = sphi %s1278_s9, %s1516_s9  }
   0x9   : > { %s40_s17 = sadd.s32 1, %s1248_s13  ;;  %s49_s18 = sadd.s32 1, %s1240_s11 }
   0xa   : > { %p42_p0 = scmp.ge.s32.totalorder %s40_s17, 2  ;;  %p56_p1 = scmp.ne.s32.totalorder %s1240_s11, %s1236_s10 }
   0xb   : > { %p57_p2 = scmp.eq.s32.totalorder %s1252_s14, 0  ;;  %p62_p3 = scmp.ne.s32.totalorder %s1236_s10, %s1232_s9 }
   0xc   : > { %s1522_s17 = smov (%p42_p0, %s40_s17), 0  ;;  %p63_p5 = scmp.eq.s32.totalorder %s786_s15, 0 }
   0xd   : > { %p1319_p4 = por %p57_p2, %p56_p1  ;;  %s44_s20 = ssub.s32 %s1248_s13, %s1522_s17 }
   0xe   : > { %p118_p6 = scmp.eq.s32.totalorder %s786_s15, 1  ;;  %p47_p7 = scmp.eq.s32.totalorder %s44_s20, 0 }
   0xf   : > { %p1325_p8 = por %p63_p5, %p62_p3  ;;  %p124_p10 = scmp.eq.s32.totalorder %s787_s16, 1 }
  0x10   : > { %p1329_p9 = por %p118_p6, %p56_p1  ;;  %p789_p12 = scmp.ge.s32.totalorder %s1252_s14, 2 }
  0x11   : > { %s1334_s23 = scalar_select %p47_p7, %s1240_s11, %s49_s18  }
  0x12   : > { %p1336_p11 = por %p124_p10, %p62_p3  ;;  %p1016_p13 = scmp.lt.s32.totalorder %s1252_s14, 2 }
  0x13   : > { %s1343_s25 = sand.u32 1, %s1240_s11   ;;  %s853_s27 = sshll.u32 %s1248_s13, 11 }
  0x14   : > { %s790_s26 = sshll.u32 %s1343_s25, 7  ;;  %s157_s30 = scalar_lea.hbm %s1507_s0, %s853_s27 }
  0x15   : > { %s148_s3 = scalar_lea.vmem [#allocation2], %s790_s26  ;;  %p1356_p0 = pnand %p1016_p13, %p1319_p4 }
  0x16   : > { %s158_s4 = sshll.u32 %s148_s3, 4  ;;  %p796_p1 = scmp.ge.s32.totalorder %s1252_s14, 1  ;;  %s159_s4 = int_to_ptr.vmem [resolvable:$true] %s158_s4 }
  0x17   : > { %s145_s6 = scalar_lea.sflag [#allocation3], %s1343_s25  ;;  %p1114_p2 = pneg %p1356_p0 }
  0x18   : > { %s1125_s7 = scalar_lea.vmem %s159_s4, 2048  ;;  %s1254_s8 = smov [#allocation2]  }
  0x19   : > { %p1126_p3 = scmp.ne.s32.totalorder %s159_s4, %s1125_s7  ;;  %s1130_s15 = sshll.u32 %s1254_s8, 4  ;;  %s1131_s15 = int_to_ptr.vmem [resolvable:$false] %s1130_s15 }
  0x1a   : > { %s1132_s16 = scalar_lea.vmem %s1131_s15, 4096  ;;  %p1133_p4 = scmp.lt.s32.totalorder %s159_s4, %s1131_s15 }
  0x1b   : > { %p1128_p5 = pnand %p1126_p3, %p1114_p2  ;;  %p1134_p7 = scmp.lt.s32.totalorder %s1132_s16, %s1125_s7 }
  0x1d   : > { %p1129_p6 = pneg %p1128_p5  ;;  %p1135_p10 = por %p1134_p7, %p1133_p4 }
  0x1f   : > { %p1136_p13 = pnand %p1135_p10, %p1129_p6 }
  0x21   : > { %1139 = shalt.err (!%p1136_p13)
}
  0x22   : > { %s1255_s18 = smov 128   ;;  %s1256_s19 = smov 8  }
  0x23   : > { %1008 = dma.hbm_to_vmem [thread:$0]  (!%p1356_p0), %s157_s30, 2048, %s159_s4, %s145_s6, %s1255_s18, %s1255_s18, %s1256_s19  }
  0x24   : > { %p188_p3 = scmp.lt.s32.totalorder %s1252_s14, 3  ;;  %s179_s29 = scalar_lea.hbm %s1508_s1, %s853_s27 }
  0x25   : > { %s172_s7 = scalar_lea.vmem [#allocation5], %s790_s26  ;;  %s169_s15 = scalar_lea.sflag [#allocation6], %s1343_s25 }
  0x26   : > { %p1377_p5 = pnand %p796_p1, %p188_p3  ;;  %s180_s8 = sshll.u32 %s172_s7, 4  ;;  %s181_s8 = int_to_ptr.vmem [resolvable:$true] %s180_s8 }
  0x27   : > { %s1153_s16 = scalar_lea.vmem %s181_s8, 2048  ;;  %s1257_s30 = smov [#allocation5]  }
  0x28   : > { %p1154_p6 = scmp.ne.s32.totalorder %s181_s8, %s1153_s16  ;;  %s1158_s4 = sshll.u32 %s1257_s30, 4  ;;  %s1159_s4 = int_to_ptr.vmem [resolvable:$false] %s1158_s4 }
  0x29   : > { %s1160_s27 = scalar_lea.vmem %s1159_s4, 4096  ;;  %p1161_p10 = scmp.lt.s32.totalorder %s181_s8, %s1159_s4 }
  0x2a   : > { %p1156_p4 = pnand %p1154_p6, %p1114_p2  ;;  %p1162_p1 = scmp.lt.s32.totalorder %s1160_s27, %s1153_s16 }
  0x2c   : > { %p1157_p7 = pneg %p1156_p4  ;;  %p1163_p13 = por %p1162_p1, %p1161_p10 }
  0x2e   : > { %p1164_p3 = pnand %p1163_p13, %p1157_p7 }
  0x30   : > { %1167 = shalt.err (!%p1164_p3)
}
  0x31   : > { %s1258_s6 = smov 64   ;;  %s1259_s26 = smov 4  }
  0x32   : > { %1011 = dma.hbm_to_vmem [thread:$0]  (!%p1356_p0), %s179_s29, 2048, %s181_s8, %s169_s15, %s1258_s6, %s1258_s6, %s1259_s26  }
  0x33   : > { %192 = sbr.rel (%p1377_p5) target bundleno = 335 (0x14f), region = 28  ;;  %s1392_s25 = sand.u32 (!%p1377_p5), 1, %s1236_s10  }
  0x34   : > { %s797_s18 = sshll.u32 (!%p1377_p5), %s1392_s25, 7  ;;  %s195_s19 = scalar_lea.sflag (!%p1377_p5), [#allocation3], %s1392_s25 }
  0x35   : > { %s1396_s20 = scalar_lea.vmem (!%p1377_p5), [#allocation2], %s797_s18 }
  0x38   : > { %1219 = dma.done.wait (%p1325_p8), %s195_s19, 2048  }
  0x39   : > { %1221 = vsyncadd (%p1325_p8), %s195_s19, 4294965248  ;;  %s204_s5 = scalar_lea.sflag [#allocation6], %s1392_s25  ;;  %s1403_s28 = scalar_lea.vmem [#allocation5], %s797_s18 }
  0x3a   : > { %1223 = dma.done.wait (%p1325_p8), %s204_s5, 2048  }
  0x3b   : > { %1225 = vsyncadd (%p1325_p8), %s204_s5, 4294965248  ;;  %v1072_v0 = vld [vmem:[%s1403_s28 + $0x78] sm:$0xff]   ;;  %v1074_v2 = vld [vmem:[%s1403_s28 + $0x70] sm:$0xff]   ;;  %s799_s21 = sshll.u32 %s1392_s25, 6  ;;  %s871_s7 = sshll.u32 %s1244_s12, 10 }
  0x3c   : > { %v1073_v1 = vld [vmem:[%s1403_s28 + $0x38] sm:$0xff]   ;;  %919 = vmatprep.subr.bf16.mxu0 %v1072_v0  ;;  %983 = vmatprep.subr.bf16.mxu1 %v1072_v0  ;;  %v1075_v3 = vld [vmem:[%s1403_s28 + $0x30] sm:$0xff]   ;;  %v1076_v4 = vld [vmem:[%s1403_s28 + $0x68] sm:$0xff]   ;;  %s1442_s29 = scalar_lea.vmem [#allocation7], %s799_s21  ;;  %s1457_s16 = scalar_lea.hbm %s1509_s2, %s871_s7 }
  0x3d   : > { %920 = vmatpush3.bf16.msra.mxu0 %v1073_v1  ;;  %991 = vmatpush3.bf16.msra.mxu1 %v1073_v1  ;;  %v1077_v5 = vld [vmem:[%s1403_s28 + $0x28] sm:$0xff]   ;;  %v1078_v6 = vld [vmem:[%s1403_s28 + $0x60] sm:$0xff]   ;;  %v1080_v8 = vld [vmem:[%s1403_s28 + $0x58] sm:$0xff]   ;;  %s670_s3 = sshll.u32 %s1442_s29, 4  ;;  %s654_s30 = scalar_lea.sflag [#allocation4], %s1392_s25  ;;  %s1452_s3 = int_to_ptr.vmem [resolvable:$true] %s670_s3 }
  0x3e   : > { %921 = vmatprep.subr.bf16.mxu0 %v1074_v2  ;;  %984 = vmatprep.subr.bf16.mxu1 %v1074_v2  ;;  %v1079_v7 = vld [vmem:[%s1403_s28 + $0x20] sm:$0xff]   ;;  %v1081_v9 = vld [vmem:[%s1403_s28 + $0x18] sm:$0xff]   ;;  %v1082_v10 = vld [vmem:[%s1403_s28 + $0x50] sm:$0xff]   ;;  %s1168_s12 = scalar_lea.vmem %s1452_s3, 1024  ;;  %s1260_s4 = smov [#allocation7]  }
  0x3f   : > { %v1090_v11 = vld [vmem:[%s1396_s20 + $0x4] ss:$8 sps:$4 sm:$0xff]   ;;  %v1083_v13 = vld [vmem:[%s1403_s28 + $0x10] sm:$0xff]   ;;  %v1088_v18 = vld [vmem:[%s1396_s20] ss:$8 sps:$4 sm:$0xff]   ;;  %p1169_p8 = scmp.ne.s32.totalorder %s1452_s3, %s1168_s12  ;;  %s1172_s27 = sshll.u32 %s1260_s4, 4  ;;  %s1173_s27 = int_to_ptr.vmem [resolvable:$false] %s1172_s27 }
  0x40   : > { %v1093_v12 = vld [vmem:[%s1396_s20 + $0x44] ss:$8 sps:$4 sm:$0xff]   ;;  %492 = vmatprep.mubr.bf16.mxu0 %v1090_v11  ;;  %v1091_v19 = vld [vmem:[%s1396_s20 + $0x40] ss:$8 sps:$4 sm:$0xff]   ;;  %v1094_v20 = vld [vmem:[%s1396_s20 + $0x14] ss:$8 sps:$4 sm:$0xff]   ;;  %p1175_p5 = scmp.lt.s32.totalorder %s1452_s3, %s1173_s27 }
  0x41   : > { %922 = vmatpush3.bf16.msra.mxu0 %v1075_v3  ;;  %992 = vmatpush3.bf16.msra.mxu1 %v1075_v3  ;;  %v1084_v14 = vld [vmem:[%s1403_s28 + $0x48] sm:$0xff]   ;;  %v1086_v16 = vld [vmem:[%s1403_s28 + $0x40] sm:$0xff]   ;;  %v1096_v21 = vld [vmem:[%s1396_s20 + $0x54] ss:$8 sps:$4 sm:$0xff]   ;;  %p1170_p0 = pnand %p1169_p8, %p1329_p9  ;;  %s1174_s6 = scalar_lea.vmem %s1173_s27, 2048 }
  0x42   : > { %923 = vmatprep.subr.bf16.mxu0 %v1076_v4  ;;  %985 = vmatprep.subr.bf16.mxu1 %v1076_v4  ;;  %v1085_v15 = vld [vmem:[%s1403_s28 + $0x8] sm:$0xff]   ;;  %v1087_v17 = vld [vmem:[%s1403_s28] sm:$0xff]   ;;  %v1098_v22 = vld [vmem:[%s1396_s20 + $0x10] ss:$8 sps:$4 sm:$0xff]   ;;  %p1176_p6 = scmp.lt.s32.totalorder %s1174_s6, %s1168_s12 }
  0x43   : > { %524 = vmatprep.mubr.bf16.mxu1 %v1093_v12  ;;  %v1099_v23 = vld [vmem:[%s1396_s20 + $0x50] ss:$8 sps:$4 sm:$0xff]   ;;  %v1100_v24 = vld [vmem:[%s1396_s20 + $0x24] ss:$8 sps:$4 sm:$0xff]   ;;  %v1104_v26 = vld [vmem:[%s1396_s20 + $0x20] ss:$8 sps:$4 sm:$0xff]   ;;  %p1171_p2 = pneg %p1170_p0 }
  0x44   : > { %v1102_v25 = vld [vmem:[%s1396_s20 + $0x64] ss:$8 sps:$4 sm:$0xff]   ;;  %v1105_v27 = vld [vmem:[%s1396_s20 + $0x60] ss:$8 sps:$4 sm:$0xff]   ;;  %v1106_v28 = vld [vmem:[%s1396_s20 + $0x34] ss:$8 sps:$4 sm:$0xff]   ;;  %p1177_p4 = por %p1176_p6, %p1175_p5 }
  0x45   : > { %924 = vmatpush3.bf16.msra.mxu0 %v1077_v5  ;;  %993 = vmatpush3.bf16.msra.mxu1 %v1077_v5  ;;  %v1108_v29 = vld [vmem:[%s1396_s20 + $0x74] ss:$8 sps:$4 sm:$0xff]   ;;  %v1110_v30 = vld [vmem:[%s1396_s20 + $0x30] ss:$8 sps:$4 sm:$0xff]  }
  0x46   : > { %925 = vmatprep.subr.bf16.mxu0 %v1078_v6  ;;  %986 = vmatprep.subr.bf16.mxu1 %v1078_v6  ;;  %v1111_v31 = vld [vmem:[%s1396_s20 + $0x70] ss:$8 sps:$4 sm:$0xff]   ;;  %p1178_p7 = pnand %p1177_p4, %p1171_p2 }
  0x49   : > { %926 = vmatpush3.bf16.msra.mxu0 %v1079_v7  ;;  %994 = vmatpush3.bf16.msra.mxu1 %v1079_v7 }
  0x4a   : > { %927 = vmatprep.subr.bf16.mxu0 %v1080_v8  ;;  %987 = vmatprep.subr.bf16.mxu1 %v1080_v8 }
  0x4d   : > { %928 = vmatpush3.bf16.msra.mxu0 %v1081_v9  ;;  %995 = vmatpush3.bf16.msra.mxu1 %v1081_v9 }
  0x4e   : > { %929 = vmatprep.subr.bf16.mxu0 %v1082_v10  ;;  %988 = vmatprep.subr.bf16.mxu1 %v1082_v10 }
  0x51   : > { %930 = vmatpush3.bf16.msra.mxu0 %v1083_v13  ;;  %996 = vmatpush3.bf16.msra.mxu1 %v1083_v13 }
  0x52   : > { %931 = vmatprep.subr.bf16.mxu0 %v1084_v14  ;;  %989 = vmatprep.subr.bf16.mxu1 %v1084_v14 }
  0x55   : > { %932 = vmatpush3.bf16.msra.mxu0 %v1085_v15  ;;  %997 = vmatpush3.bf16.msra.mxu1 %v1085_v15 }
  0x56   : > { %933 = vmatprep.subr.bf16.mxu0 %v1086_v16  ;;  %990 = vmatprep.subr.bf16.mxu1 %v1086_v16 }
  0x59   : > { %934 = vmatpush3.bf16.msra.mxu0 %v1087_v17  ;;  %998 = vmatpush3.bf16.msra.mxu1 %v1087_v17 }
  0x5c   : > { %493 = vmatmul.mubr.bf16.vlgmr.msra.gmra.mxu0 %v1088_v18  ;;  %525 = vmatmul.mubr.bf16.vlgmr.msra.gmra.mxu1 %v1091_v19 }
  0x5d   : > { %500 = vmatprep.mubr.bf16.mxu0 %v1094_v20  ;;  %532 = vmatprep.mubr.bf16.mxu1 %v1096_v21 }
  0x64   : > { %501 = vmatmul.mubr.bf16.gmra.mxu0 %v1098_v22  ;;  %533 = vmatmul.mubr.bf16.gmra.mxu1 %v1099_v23 }
  0x65   : > { %508 = vmatprep.mubr.bf16.mxu0 %v1100_v24  ;;  %540 = vmatprep.mubr.bf16.mxu1 %v1102_v25 }
  0x6c   : > { %509 = vmatmul.mubr.bf16.gmra.mxu0 %v1104_v26  ;;  %541 = vmatmul.mubr.bf16.gmra.mxu1 %v1105_v27 }
  0x6d   : > { %516 = vmatprep.mubr.bf16.mxu0 %v1106_v28  ;;  %548 = vmatprep.mubr.bf16.mxu1 %v1108_v29 }
  0x74   : > { %517 = vmatmul.mubr.bf16.gmra.mxu0 %v1110_v30  ;;  %549 = vmatmul.mubr.bf16.gmra.mxu1 %v1111_v31 }
 0x11c   : > { %v935_v32 = vpop.f32.mrf.mxu0  ;;  %v959_v33 = vpop.f32.mrf.mxu1 }
 0x11e   : > { %v936_v34 = vpop.f32.mrf.mxu0  ;;  %v960_v35 = vpop.f32.mrf.mxu1 }
 0x11f   : > { %v937_v38 = vadd.f32 %v936_v34, %v935_v32  ;;  %v961_v39 = vadd.f32 %v960_v35, %v959_v33 }
 0x120   : > { %v938_v36 = vpop.f32.mrf.mxu0  ;;  %v962_v37 = vpop.f32.mrf.mxu1 }
 0x121   : > { %v557_v46 = vmul.f32 0.0625, %v937_v38  ;;  %v565_v47 = vmul.f32 0.0625, %v961_v39 }
 0x122   : > { %v939_v40 = vpop.f32.mrf.mxu0  ;;  %v963_v41 = vpop.f32.mrf.mxu1 }
 0x123   : > { %v940_v42 = vadd.f32 %v939_v40, %v938_v36  ;;  %v964_v43 = vadd.f32 %v963_v41, %v962_v37 }
 0x124   : > { %v941_v44 = vpop.f32.mrf.mxu0  ;;  %v965_v45 = vpop.f32.mrf.mxu1 }
 0x125   : > { %v558_v48 = vmul.f32 0.0625, %v940_v42  ;;  %v566_v49 = vmul.f32 0.0625, %v964_v43 }
 0x126   : > { %v942_v50 = vpop.f32.mrf.mxu0  ;;  %v966_v51 = vpop.f32.mrf.mxu1 }
 0x127   : > { %v875_v52 = vpack.c.bf16 %v558_v48, %v557_v46  ;;  %v895_v53 = vpack.c.bf16 %v566_v49, %v565_v47  ;;  %v943_v56 = vadd.f32 %v942_v50, %v941_v44  ;;  %v967_v57 = vadd.f32 %v966_v51, %v965_v45 }
 0x128   : > { %v944_v54 = vpop.f32.mrf.mxu0  ;;  %v968_v55 = vpop.f32.mrf.mxu1 }
 0x129   : > { %876 = vst [vmem:[%s1442_s29] sm:$0xff] %v875_v52   ;;  %915 = vst [vmem:[%s1442_s29 + $0x20] sm:$0xff] %v895_v53   ;;  %v559_v0 = vmul.f32 0.0625, %v943_v56  ;;  %v567_v1 = vmul.f32 0.0625, %v967_v57 }
 0x12a   : > { %v945_v58 = vpop.f32.mrf.mxu0  ;;  %v969_v59 = vpop.f32.mrf.mxu1 }
 0x12b   : > { %v946_v60 = vadd.f32 %v945_v58, %v944_v54  ;;  %v970_v61 = vadd.f32 %v969_v59, %v968_v55 }
 0x12c   : > { %v947_v62 = vpop.f32.mrf.mxu0  ;;  %v971_v63 = vpop.f32.mrf.mxu1 }
 0x12d   : > { %v560_v2 = vmul.f32 0.0625, %v946_v60  ;;  %v568_v3 = vmul.f32 0.0625, %v970_v61 }
 0x12e   : > { %v948_v4 = vpop.f32.mrf.mxu0  ;;  %v972_v5 = vpop.f32.mrf.mxu1 }
 0x12f   : > { %v880_v6 = vpack.c.bf16 %v560_v2, %v559_v0  ;;  %v900_v7 = vpack.c.bf16 %v568_v3, %v567_v1  ;;  %v949_v10 = vadd.f32 %v948_v4, %v947_v62  ;;  %v973_v11 = vadd.f32 %v972_v5, %v971_v63 }
 0x130   : > { %v950_v8 = vpop.f32.mrf.mxu0  ;;  %v974_v9 = vpop.f32.mrf.mxu1 }
 0x131   : > { %912 = vst [vmem:[%s1442_s29 + $0x8] sm:$0xff] %v880_v6   ;;  %916 = vst [vmem:[%s1442_s29 + $0x28] sm:$0xff] %v900_v7   ;;  %v561_v18 = vmul.f32 0.0625, %v949_v10  ;;  %v569_v19 = vmul.f32 0.0625, %v973_v11 }
 0x132   : > { %v951_v12 = vpop.f32.mrf.mxu0  ;;  %v975_v13 = vpop.f32.mrf.mxu1 }
 0x133   : > { %v952_v14 = vadd.f32 %v951_v12, %v950_v8  ;;  %v976_v15 = vadd.f32 %v975_v13, %v974_v9 }
 0x134   : > { %v953_v16 = vpop.f32.mrf.mxu0  ;;  %v977_v17 = vpop.f32.mrf.mxu1 }
 0x135   : > { %v562_v20 = vmul.f32 0.0625, %v952_v14  ;;  %v570_v21 = vmul.f32 0.0625, %v976_v15 }
 0x136   : > { %v954_v22 = vpop.f32.mrf.mxu0  ;;  %v978_v23 = vpop.f32.mrf.mxu1 }
 0x137   : > { %v885_v24 = vpack.c.bf16 %v562_v20, %v561_v18  ;;  %v905_v25 = vpack.c.bf16 %v570_v21, %v569_v19  ;;  %v955_v28 = vadd.f32 %v954_v22, %v953_v16  ;;  %v979_v29 = vadd.f32 %v978_v23, %v977_v17 }
 0x138   : > { %v956_v26 = vpop.f32.mrf.mxu0  ;;  %v980_v27 = vpop.f32.mrf.mxu1 }
 0x139   : > { %913 = vst [vmem:[%s1442_s29 + $0x10] sm:$0xff] %v885_v24   ;;  %917 = vst [vmem:[%s1442_s29 + $0x30] sm:$0xff] %v905_v25   ;;  %v563_v34 = vmul.f32 0.0625, %v955_v28  ;;  %v571_v35 = vmul.f32 0.0625, %v979_v29 }
 0x13a   : > { %v957_v30 = vpop.f32.mrf.mxu0  ;;  %v981_v31 = vpop.f32.mrf.mxu1 }
 0x13b   : > { %v958_v32 = vadd.f32 %v957_v30, %v956_v26  ;;  %v982_v33 = vadd.f32 %v981_v31, %v980_v27 }
 0x13d   : > { %v564_v36 = vmul.f32 0.0625, %v958_v32  ;;  %v572_v37 = vmul.f32 0.0625, %v982_v33 }
 0x13f   : > { %v890_v38 = vpack.c.bf16 %v564_v36, %v563_v34  ;;  %v910_v39 = vpack.c.bf16 %v572_v37, %v571_v35 }
 0x141   : > { %914 = vst [vmem:[%s1442_s29 + $0x18] sm:$0xff] %v890_v38   ;;  %918 = vst [vmem:[%s1442_s29 + $0x38] sm:$0xff] %v910_v39  }
 0x142   : > { %1181 = shalt.err (!%p1178_p7)
}
 0x143   : > { %s1182_s26 = scalar_lea.hbm %s1457_s16, 1024  ;;  %s1186_s20 = scalar_lea.hbm %s1509_s2, 2048 }
 0x144   : > { %p1183_p10 = scmp.ne.s32.totalorder %s1457_s16, %s1182_s26  ;;  %p1187_p3 = scmp.lt.s32.totalorder %s1457_s16, %s1509_s2 }
 0x145   : > { %p1188_p8 = scmp.lt.s32.totalorder %s1186_s20, %s1182_s26 }
 0x146   : > { %p1184_p1 = pnand %p1183_p10, %p1329_p9 }
 0x147   : > { %p1189_p0 = por %p1188_p8, %p1187_p3 }
 0x148   : > { %p1185_p13 = pneg %p1184_p1 }
 0x14a   : > { %p1190_p2 = pnand %p1189_p0, %p1185_p13 }
 0x14c   : > { %1193 = shalt.err (!%p1190_p2)
}
 0x14d   : > { %s1261_s21 = smov 64   ;;  %s1262_s29 = smov 4  }
 0x14e   : > { %1003 = dma.vmem_to_hbm [thread:$0]  (%p1329_p9), %s1452_s3, 1024, %s1457_s16, %s654_s30, %s1261_s21, %s1261_s21, %s1262_s29  }
 0x14f PF: > { %s685_s7 = sand.u32 1, %s1232_s9   ;;  %p1013_p5 = pnand %p789_p12, %p1336_p11 }
 0x150   : > { %s686_s8 = scalar_lea.sflag [#allocation4], %s685_s7 }
 0x151   : > { %p1014_p6 = pneg %p1013_p5 }
 0x153   : > { %1227 = dma.done.wait (%p1014_p6), %s686_s8, 1024  }
 0x154   : > { %1229 = vsyncadd (%p1014_p6), %s686_s8, 4294966272  ;;  %s21_s14 = sadd.s32 1, %s1252_s14   ;;  %s1516_s9 = smov %s1236_s10 }
 0x155   : > { %p18_p4 = scmp.ge.s32.totalorder %s21_s14, 4   ;;  %s1517_s10 = smov %s1240_s11 }
 0x156   : > { %s1518_s11 = smov %s1334_s23  ;;  %s1519_s12 = smov %s1248_s13 }
 0x157   : > { %s1520_s13 = smov %s1522_s17  ;;  %20 = sbr.rel (!%p18_p4) target bundleno = 8 (0x8), region = 86 }
 0x15c   :  { %691 = vsyncpa [#allocation3], 1 }
 0x15d   :  { %693 = vsyncpa [#allocation3 + $0x1], 1 }
 0x15e   :  { %694 = vsyncpa [#allocation6], 1 }
 0x15f   :  { %696 = vsyncpa [#allocation6 + $0x1], 1 }
 0x160   :  { %697 = vsyncpa [#allocation4], 1 }
 0x161   :  { %699 = vsyncpa [#allocation4 + $0x1], 1 }

</bundles_post_ra>
